<compile_context>
chip_gen: v6e
topology: v6e:2x2x1
jax: 0.10.0
libtpu: 0.0.40
codegen_flags: <defaults>
</compile_context>

<pallas_src>
import functools

import numpy as np
import jax
import jax.numpy as jnp
from jax.experimental import pallas as pl
from jax.experimental.pallas import tpu as pltpu


def _round_up(x, m):
    return ((x + m - 1) // m) * m


def _patch_embed_kernel_norm(p_ref, w_ref, prm_ref, o_ref):
    # (tm, K) @ (K, E) -> (tm, E) on the MXU, f32 accumulation.
    y = jnp.dot(p_ref[...], w_ref[...], preferred_element_type=jnp.float32)
    prm = prm_ref[...]                       # (3, E): conv bias / gamma / beta (f32)
    y = y + prm[0:1, :]
    # Two-pass LayerNorm over embed_dim (eps matches torch.nn.LayerNorm).
    inv_e = 1.0 / y.shape[-1]
    mean = jnp.sum(y, axis=-1, keepdims=True) * inv_e
    c = y - mean
    var = jnp.sum(c * c, axis=-1, keepdims=True) * inv_e
    y = c * jax.lax.rsqrt(var + 1e-5)
    y = y * prm[1:2, :] + prm[2:3, :]
    o_ref[...] = y.astype(o_ref.dtype)


def _patch_embed_kernel(p_ref, w_ref, prm_ref, o_ref):
    y = jnp.dot(p_ref[...], w_ref[...], preferred_element_type=jnp.float32)
    o_ref[...] = (y + prm_ref[...]).astype(o_ref.dtype)


@functools.partial(
    jax.jit, static_argnames=("patch_size", "tm", "compute_dtype", "out_dtype"))
def patch_embed_2d(x, w, b, gamma=None, beta=None, *, patch_size=4, tm=4096,
                   compute_dtype=jnp.bfloat16, out_dtype=None):
    """x: (B, C, H, W) NCHW.  w: (E, C, p, p) Conv2d weight.  b: (E,).

    Returns (B, H//p, W//p, E), i.e. proj(x).permute(0, 2, 3, 1) [+ LayerNorm].
    Output dtype defaults to compute_dtype (bf16) to halve write-back bytes.
    """
    B, C, H, W = x.shape
    p = patch_size
    assert H % p == 0 and W % p == 0
    Hp, Wp = H // p, W // p
    E = w.shape[0]
    K = C * p * p
    M = B * Hp * Wp

    in_dtype = jnp.dtype(compute_dtype)
    o_dtype = jnp.dtype(in_dtype if out_dtype is None else out_dtype)

    # Row tile: aim for `tm` rows per step but force an even number (>=2) of
    # near-balanced grid steps (v7x has 2 TensorCores) with the sublane rule
    # (multiple of 8).  The ragged last block is handled by Pallas, so there
    # is no explicit padding of M and no post-slice of the output.
    n_steps = 2 * max(1, pl.cdiv(M, 2 * max(8, int(tm))))
    tm_eff = _round_up(pl.cdiv(M, n_steps), 8)
    grid_m = pl.cdiv(M, tm_eff)

    # --- glue: patchify (stride == kernel_size).  Cast first so a materialized
    # intermediate (if the transpose doesn't fuse) is half the bytes.
    patches = x.astype(in_dtype)
    patches = patches.reshape(B, C, Hp, p, Wp, p).transpose(0, 2, 4, 1, 3, 5)
    patches = patches.reshape(M, K)                    # rows in (c, i, j) column order

    w_mat = w.reshape(E, K).T.astype(in_dtype)         # (K, E), same (c, i, j) order

    use_norm = gamma is not None
    if use_norm:
        params = jnp.stack([b, gamma, beta], axis=0).astype(jnp.float32)   # (3, E)
        kernel = _patch_embed_kernel_norm
    else:
        params = b.reshape(1, E).astype(jnp.float32)                       # (1, E)
        kernel = _patch_embed_kernel

    out = pl.pallas_call(
        kernel,
        out_shape=jax.ShapeDtypeStruct((M, E), o_dtype),
        grid_spec=pltpu.PrefetchScalarGridSpec(
            num_scalar_prefetch=0,
            grid=(grid_m,),
            in_specs=[
                pl.BlockSpec((tm_eff, K), lambda i: (i, 0)),    # row tile of patches
                pl.BlockSpec((K, E), lambda i: (0, 0)),         # full weight, resident
                pl.BlockSpec(params.shape, lambda i: (0, 0)),   # fused bias/gamma/beta
            ],
            out_specs=pl.BlockSpec((tm_eff, E), lambda i: (i, 0)),
        ),
        compiler_params=pltpu.CompilerParams(
            dimension_semantics=("parallel",),
            # Let XLA fuse the patchify reshape/transpose (+cast) into the
            # kernel's input pipeline instead of a separate HBM round trip.
            allow_input_fusion=[True, False, False],
        ),
    )(patches, w_mat, params)

    return out.reshape(B, Hp, Wp, E)


def _reference(x, w, b, gamma, beta, patch_size):
    """Pure-JAX reference mirroring PyTorch: Conv2d(stride=kernel) + permute + LayerNorm."""
    y = jax.lax.conv_general_dilated(
        x, w, window_strides=(patch_size, patch_size), padding="VALID",
        dimension_numbers=("NCHW", "OIHW", "NCHW"))
    y = y + b.reshape(1, -1, 1, 1)
    y = jnp.transpose(y, (0, 2, 3, 1))  # (B, Hp, Wp, E)
    if gamma is not None:
        mean = jnp.mean(y, axis=-1, keepdims=True)
        var = jnp.mean((y - mean) ** 2, axis=-1, keepdims=True)
        y = (y - mean) * jax.lax.rsqrt(var + 1e-5) * gamma + beta
    return y


if __name__ == "__main__":
    # Small-but-representative shapes: B=2, in_chans=3, H=W=16, patch=4, embed=32.
    B, C, H, W = 2, 3, 16, 16
    patch_size = 4
    embed_dim = 32

    key = jax.random.PRNGKey(0)
    kx, kw, kb, kg, kbt = jax.random.split(key, 5)

    x = jax.random.normal(kx, (B, C, H, W), dtype=jnp.float32)
    # Conv2d weight/bias (deterministic synthetic init, PyTorch shapes).
    w = jax.random.normal(kw, (embed_dim, C, patch_size, patch_size),
                          dtype=jnp.float32) * 0.1
    b = jax.random.normal(kb, (embed_dim,), dtype=jnp.float32) * 0.1
    # LayerNorm params (norm_layer=nn.LayerNorm case; None for the default path).
    gamma = 1.0 + 0.1 * jax.random.normal(kg, (embed_dim,), dtype=jnp.float32)
    beta = 0.1 * jax.random.normal(kbt, (embed_dim,), dtype=jnp.float32)

    ref = _reference(x, w, b, gamma, beta, patch_size)

    # Full-precision path (f32 operands + f32 output): tight check.
    out_f32 = jax.block_until_ready(
        patch_embed_2d(x, w, b, gamma, beta, patch_size=patch_size,
                       compute_dtype=jnp.float32, out_dtype=jnp.float32))
    assert out_f32.shape == (B, H // patch_size, W // patch_size, embed_dim)
    np.testing.assert_allclose(np.asarray(out_f32), np.asarray(ref),
                               rtol=1e-4, atol=1e-4)

    # norm=None default path (f32 for a tight check).
    out_nonorm = jax.block_until_ready(
        patch_embed_2d(x, w, b, patch_size=patch_size,
                       compute_dtype=jnp.float32, out_dtype=jnp.float32))
    ref_nonorm = _reference(x, w, b, None, None, patch_size)
    np.testing.assert_allclose(np.asarray(out_nonorm), np.asarray(ref_nonorm),
                               rtol=1e-4, atol=1e-4)

    # Default (perf) path: bf16 operands + bf16 output, f32 MXU/LN math inside,
    # so only loose agreement with the f32 reference is expected.
    out_bf16 = jax.block_until_ready(
        patch_embed_2d(x, w, b, gamma, beta, patch_size=patch_size))
    assert out_bf16.dtype == jnp.bfloat16
    np.testing.assert_allclose(np.asarray(out_bf16, dtype=np.float32),
                               np.asarray(ref), rtol=1e-1, atol=1e-1)

    print("KERNEL_OK")
</pallas_src>

<mosaic_0001>
module attributes {stable_mosaic.version = 11 : i64} {
  func.func @_patch_embed_kernel_norm(%arg0: i32, %arg1: memref<16x48xf32, #tpu.memory_space<vmem>>, %arg2: memref<48x32xf32, #tpu.memory_space<vmem>>, %arg3: memref<3x32xf32, #tpu.memory_space<vmem>>, %arg4: memref<16x32xf32, #tpu.memory_space<vmem>>) attributes {dimension_semantics = [#tpu.dimension_semantics<parallel>], iteration_bounds = array<i64: 2>, scalar_prefetch = 0 : i64, scratch_operands = 0 : i64, tpu.core_type = #tpu.core_type<tc>, window_params = [{transform_indices = @transform_0, window_bounds = array<i64: 16, 48>}, {pipeline_mode = #tpu.pipeline_mode<synchronous>, transform_indices = @transform_1, window_bounds = array<i64: 48, 32>}, {pipeline_mode = #tpu.pipeline_mode<synchronous>, transform_indices = @transform_2, window_bounds = array<i64: 3, 32>}, {transform_indices = @transform_3, window_bounds = array<i64: 16, 32>}]} {
    %c0 = arith.constant 0 : index
    %c0_0 = arith.constant 0 : index
    %0 = vector.load %arg1[%c0, %c0_0] : memref<16x48xf32, #tpu.memory_space<vmem>>, vector<16x48xf32>
    %c0_1 = arith.constant 0 : index
    %c0_2 = arith.constant 0 : index
    %1 = vector.load %arg2[%c0_1, %c0_2] : memref<48x32xf32, #tpu.memory_space<vmem>>, vector<48x32xf32>
    %cst = arith.constant dense<0.000000e+00> : vector<16x32xf32>
    %2 = tpu.matmul %0, %1, %cst {dimension_numbers = #tpu.dot_dimension_numbers<[1], [0], [0], [1], [0, 0, 1, 1], [], []>} : vector<16x48xf32>, vector<48x32xf32>, vector<16x32xf32> -> vector<16x32xf32>
    %c0_3 = arith.constant 0 : index
    %c0_4 = arith.constant 0 : index
    %3 = vector.load %arg3[%c0_3, %c0_4] : memref<3x32xf32, #tpu.memory_space<vmem>>, vector<3x32xf32>
    %4 = vector.extract_strided_slice %3 {offsets = [0, 0], sizes = [1, 32], strides = [1, 1]} : vector<3x32xf32> to vector<1x32xf32>
    %5 = vector.broadcast %4 : vector<1x32xf32> to vector<16x32xf32>
    %6 = arith.addf %2, %5 : vector<16x32xf32>
    %cst_5 = arith.constant dense<0.000000e+00> : vector<16xf32>
    %7 = vector.multi_reduction <add>, %6, %cst_5 [1] : vector<16x32xf32> to vector<16xf32>
    %8 = vector.shape_cast %7 : vector<16xf32> to vector<16x1xf32>
    %cst_6 = arith.constant 3.125000e-02 : f32
    %9 = vector.broadcast %cst_6 : f32 to vector<16x1xf32>
    %10 = arith.mulf %8, %9 : vector<16x1xf32>
    %11 = vector.broadcast %10 : vector<16x1xf32> to vector<16x32xf32>
    %12 = arith.subf %6, %11 : vector<16x32xf32>
    %13 = arith.mulf %12, %12 : vector<16x32xf32>
    %cst_7 = arith.constant dense<0.000000e+00> : vector<16xf32>
    %14 = vector.multi_reduction <add>, %13, %cst_7 [1] : vector<16x32xf32> to vector<16xf32>
    %15 = vector.shape_cast %14 : vector<16xf32> to vector<16x1xf32>
    %cst_8 = arith.constant 3.125000e-02 : f32
    %16 = vector.broadcast %cst_8 : f32 to vector<16x1xf32>
    %17 = arith.mulf %15, %16 : vector<16x1xf32>
    %cst_9 = arith.constant 9.99999974E-6 : f32
    %18 = vector.broadcast %cst_9 : f32 to vector<16x1xf32>
    %19 = arith.addf %17, %18 : vector<16x1xf32>
    %20 = math.rsqrt %19 : vector<16x1xf32>
    %21 = vector.broadcast %20 : vector<16x1xf32> to vector<16x32xf32>
    %22 = arith.mulf %12, %21 : vector<16x32xf32>
    %23 = vector.extract_strided_slice %3 {offsets = [1, 0], sizes = [1, 32], strides = [1, 1]} : vector<3x32xf32> to vector<1x32xf32>
    %24 = vector.broadcast %23 : vector<1x32xf32> to vector<16x32xf32>
    %25 = arith.mulf %22, %24 : vector<16x32xf32>
    %26 = vector.extract_strided_slice %3 {offsets = [2, 0], sizes = [1, 32], strides = [1, 1]} : vector<3x32xf32> to vector<1x32xf32>
    %27 = vector.broadcast %26 : vector<1x32xf32> to vector<16x32xf32>
    %28 = arith.addf %25, %27 : vector<16x32xf32>
    %c0_10 = arith.constant 0 : index
    %c0_11 = arith.constant 0 : index
    %29 = vector.load %arg4[%c0_10, %c0_11] : memref<16x32xf32, #tpu.memory_space<vmem>>, vector<16x32xf32>
    tpu.vector_store %arg4[%c0_10, %c0_11], %28 {strides = array<i32>} : memref<16x32xf32, #tpu.memory_space<vmem>>, vector<16x32xf32>,
    return
  }
  func.func @transform_0(%arg0: i32) -> (i32, i32) {
    %c0_i32 = arith.constant 0 : i32
    %c0_i32_0 = arith.constant 0 : i32
    return %arg0, %c0_i32 : i32, i32
  }
  func.func @transform_1(%arg0: i32) -> (i32, i32) {
    %c0_i32 = arith.constant 0 : i32
    %c0_i32_0 = arith.constant 0 : i32
    %c0_i32_1 = arith.constant 0 : i32
    return %c0_i32, %c0_i32_0 : i32, i32
  }
  func.func @transform_2(%arg0: i32) -> (i32, i32) {
    %c0_i32 = arith.constant 0 : i32
    %c0_i32_0 = arith.constant 0 : i32
    %c0_i32_1 = arith.constant 0 : i32
    return %c0_i32, %c0_i32_0 : i32, i32
  }
  func.func @transform_3(%arg0: i32) -> (i32, i32) {
    %c0_i32 = arith.constant 0 : i32
    %c0_i32_0 = arith.constant 0 : i32
    return %arg0, %c0_i32 : i32, i32
  }
}

</mosaic_0001>

<bundles_post_ra>
// kernel: patch_embed_2d.1
= control target key start
LH: loop header
LB: loop body
LE: loop exit
PB: predicated region body
PF: predicated region fallthrough
CT: control target
= control target key end

     0   :  { %8 = vsyncpa [#allocation3], 0  ;;  %s680_s0 = inlined_call_operand.vmem [shape: f32[32,48], index: 0, kind: input, shape index: {}]   ;;  %s681_s1 = inlined_call_operand.vmem [shape: f32[48,32], index: 1, kind: input, shape index: {}]   ;;  %s682_s2 = inlined_call_operand.vmem [shape: f32[3,32], index: 2, kind: input, shape index: {}]   ;;  %s683_s3 = inlined_call_operand.hbm [shape: f32[32,32], index: 3, kind: output, shape index: {}]  }
   0x1   :  { %10 = vsyncpa [#allocation3 + $0x1], 0  ;;  %s552_s12 = smov 0   ;;  %s554_s13 = smov 0  }
   0x2   :  { %s556_s14 = smov 0   ;;  %s558_s15 = smov 0  }
   0x3 LB: > { %s573_s16 = sadd.s32 4294967295, %s527_s15   ;;  %s384_s17 = sadd.s32 4294967294, %s527_s15   ;;  %s527_s15 = sphi %s558_s15, %s689_s15   ;;  %s523_s14 = sphi %s556_s14, %s688_s14   ;;  %s519_s13 = sphi %s554_s13, %s687_s13   ;;  %s515_s12 = sphi %s552_s12, %s686_s12  }
   0x4   : > { %s577_s18 = sadd.s32 1, %s527_s15   ;;  %s91_s19 = sadd.s32 1, %s523_s14 }
   0x5   : > { %s88_s20 = ssub.s32 %s527_s15, %s577_s18  ;;  %p101_p0 = scmp.ne.s32.totalorder %s523_s14, %s519_s13 }
   0x6   : > { %p89_p1 = scmp.eq.s32.totalorder %s88_s20, 0  ;;  %p102_p2 = scmp.eq.s32.totalorder %s573_s16, 1 }
   0x7   : > { %p107_p3 = scmp.ne.s32.totalorder %s519_s13, %s515_s12  ;;  %p108_p4 = scmp.eq.s32.totalorder %s384_s17, 1 }
   0x8   : > { %s588_s21 = scalar_select %p89_p1, %s523_s14, %s91_s19  }
   0x9   : > { %p590_p5 = por %p102_p2, %p101_p0  ;;  %p594_p6 = por %p108_p4, %p107_p3 }
   0xa   : > { %p387_p7 = scmp.ge.s32.totalorder %s527_s15, 1  ;;  %p141_p8 = scmp.lt.s32.totalorder %s527_s15, 3 }
   0xc   : > { %p142_p9 = pnand %p387_p7, %p141_p8 }
   0xd   : > { %s389_s28 = sshll.u32 (!%p142_p9), %s573_s16, 1  ;;  %s162_s25 = sand.u32 (!%p142_p9), 1, %s519_s13  }
   0xe   : > { %145 = sbr.rel (%p142_p9) target bundleno = 555 (0x22b), region = 32  ;;  %p166_p10 = scmp.lt.s32.totalorder (!%p142_p9), %s389_s28, 3 }
   0xf   : > { %s388_s26 = sshll.u32 (!%p142_p9), %s162_s25, 4  ;;  %s398_s27 = sshll.u32 (!%p142_p9), %s573_s16, 8 }
  0x10   : > { %s635_s5 = scalar_lea.hbm (!%p142_p9), %s683_s3, %s398_s27  ;;  %s529_s7 = smov (!%p142_p9), [#allocation2]  }
  0x11   : > { %s471_s8 = sshll.u32 (!%p142_p9), %s529_s7, 4  ;;  %s472_s8 = int_to_ptr.vmem [resolvable:$false] %s471_s8 }
  0x12   : > { %s473_s9 = scalar_lea.vmem (!%p142_p9), %s472_s8, 512 }
  0x13   : > { %v179_v0 = vld [vmem:[%s681_s1 + $0x28] sm:$0xff]  ;;  %v178_v1 = vld [vmem:[%s681_s1 + $0x20] sm:$0xff]  ;;  %v177_v2 = vld [vmem:[%s681_s1 + $0x18] sm:$0xff]  ;;  %s691_s28 = smov (!%p166_p10, %s389_s28), 3  ;;  %vm185_vm0 = vcmask 392192   ;;  %v181_v8 = vlaneseq  ;;  %vm267_vm1 = vcmask 261120  }
  0x14   : > { %407 = vmatprep.subr.mxu0 %v179_v0  ;;  %v176_v3 = vld [vmem:[%s681_s1 + $0x10] sm:$0xff]  ;;  %s390_s6 = sshll.u32 %s691_s28, 3  ;;  %v175_v4 = vld [vmem:[%s681_s1 + $0x8] sm:$0xff]  ;;  %v174_v6 = vld [vmem:[%s681_s1] sm:$0xff]  ;;  %s164_s28 = scalar_lea.vmem [#allocation2], %s388_s26 }
  0x15   : > { %408 = vmatpush3.msra.mxu0 %v179_v0  ;;  %s169_s11 = scalar_lea.vmem %s680_s0, %s390_s6  ;;  %v182_v9 = vshrl.u32 %v181_v8, 7  ;;  %v180_v11 = vld [vmem:[%s682_s2] sm:$0x7]  ;;  %s322_s29 = sshll.u32 %s164_s28, 4  ;;  %s637_s29 = int_to_ptr.vmem [resolvable:$true] %s322_s29 }
  0x16   : > { %409 = vmatprep.subr.mxu0 %v178_v1  ;;  %v172_v5 = vld [vmem:[%s169_s11] sm:$0xff]  ;;  %v173_v7 = vld [vmem:[%s169_s11 + $0x8] sm:$0xff]  ;;  %s640_s6 = scalar_lea.sflag [#allocation3], %s162_s25  ;;  %s467_s16 = scalar_lea.vmem %s637_s29, 256 }
  0x17   : > { %410 = vmatpush3.msra.mxu0 %v178_v1  ;;  %419 = vmatprep.mubr.msk.f32.mxu0 %vm185_vm0, %v172_v5  ;;  %v183_v10 = vsub.s32 0, %v182_v9  ;;  %v296_v35 = vsub.s32 1, %v182_v9  ;;  %v302_v36 = vsub.s32 2, %v182_v9  ;;  %p468_p11 = scmp.ne.s32.totalorder %s637_s29, %s467_s16  ;;  %p474_p0 = scmp.lt.s32.totalorder %s637_s29, %s472_s8 }
  0x18   : > { %411 = vmatprep.subr.mxu0 %v177_v2  ;;  %p475_p1 = scmp.lt.s32.totalorder %s473_s9, %s467_s16 }
  0x19   : > { %412 = vmatpush3.msra.mxu0 %v177_v2  ;;  %v184_v13 = vrot.slane %v180_v11, %v183_v10  ;;  %v297_v37 = vrot.slane %v180_v11, %v296_v35  ;;  %v303_v39 = vrot.slane %v180_v11, %v302_v36  ;;  %p469_p12 = pnand %p468_p11, %p590_p5 }
  0x1a   : > { %413 = vmatprep.subr.mxu0 %v176_v3  ;;  %p476_p2 = por %p475_p1, %p474_p0 }
  0x1b   : > { %414 = vmatpush3.msra.mxu0 %v176_v3  ;;  %p470_p13 = pneg %p469_p12 }
  0x1c   : > { %415 = vmatprep.subr.mxu0 %v175_v4 }
  0x1d   : > { %416 = vmatpush3.msra.mxu0 %v175_v4  ;;  %p477_p3 = pnand %p476_p2, %p470_p13 }
  0x1e   : > { %417 = vmatprep.subr.mxu0 %v174_v6 }
  0x1f   : > { %418 = vmatpush3.msra.mxu0 %v174_v6 }
  0x20   : > { %420 = vmatmul.mubr.msk.f32.vlgmr.msra.gmra.mxu0 %vm185_vm0, %v173_v7 }
  0xe0   : > { %v421_v12 = vpop.f32.mrf.mxu0 }
  0xe1   : > { %v264_v16 = vadd.f32 %v421_v12, %v184_v13 }
  0xe2   : > { %v258_v14 = vpop.f32.mrf.mxu0 }
  0xe3   : > { %v259_v15 = vadd.f32 %v258_v14, %v184_v13  ;;  %v271_v18 = vsel %vm267_vm1, %v264_v16, 0.0 }
  0xe5   : > { %v268_v17 = vsel %vm267_vm1, %v259_v15, 0.0 }
  0xe6   : > { %269 = vadd.xlane.f32.xlu0 %v268_v17 }
  0xea   : > { %272 = vadd.xlane.f32.xlu0 %v271_v18 }
 0x16f   : > { %v270_v19 = vpop.xlane.xlu0 %269 }
 0x170   : > { %v274_v20 = vmul.f32 0.03125, %v270_v19 }
 0x172   : > { %v276_v21 = vsub.f32 %v259_v15, %v274_v20 }
 0x173   : > { %v273_v22 = vpop.xlane.xlu0 %272 }
 0x174   : > { %v275_v23 = vmul.f32 0.03125, %v273_v22  ;;  %v278_v24 = vmul.f32 %v276_v21, %v276_v21 }
 0x176   : > { %v277_v25 = vsub.f32 %v264_v16, %v275_v23  ;;  %v280_v26 = vsel %vm267_vm1, %v278_v24, 0.0 }
 0x177   : > { %281 = vadd.xlane.f32.xlu1 %v280_v26 }
 0x178   : > { %v279_v27 = vmul.f32 %v277_v25, %v277_v25 }
 0x17a   : > { %v283_v28 = vsel %vm267_vm1, %v279_v27, 0.0 }
 0x17b   : > { %284 = vadd.xlane.f32.xlu1 %v283_v28 }
 0x200   : > { %v282_v29 = vpop.xlane.xlu1 %281 }
 0x201   : > { %v286_v30 = vmul.f32 0.03125, %v282_v29 }
 0x203   : > { %v288_v31 = vadd.f32 1e-05, %v286_v30 }
 0x204   : > { %v285_v32 = vpop.xlane.xlu1 %284 }
 0x205   : > { %463 = vrsqrt.f32 %v288_v31  ;;  %v287_v33 = vmul.f32 0.03125, %v285_v32 }
 0x207   : > { %v289_v34 = vadd.f32 1e-05, %v287_v33 }
 0x209   : > { %465 = vrsqrt.f32 %v289_v34 }
 0x212   : > { %v464_v38 = vpop.eup %463 }
 0x213   : > { %v292_v40 = vmul.f32 %v464_v38, %v276_v21 }
 0x215   : > { %v298_v41 = vmul.f32 %v297_v37, %v292_v40 }
 0x216   : > { %v466_v42 = vpop.eup %465 }
 0x217   : > { %v293_v43 = vmul.f32 %v466_v42, %v277_v25  ;;  %v304_v44 = vadd.f32 %v303_v39, %v298_v41 }
 0x219   : > { %v299_v45 = vmul.f32 %v297_v37, %v293_v43  ;;  %306 = vst.msk [vmem:[%s164_s28] sm:$0xff] %vm267_vm1, %v304_v44 }
 0x21b   : > { %v305_v46 = vadd.f32 %v303_v39, %v299_v45 }
 0x21d   : > { %307 = vst.msk [vmem:[%s164_s28 + $0x8] sm:$0xff] %vm267_vm1, %v305_v46 }
 0x21e   : > { %480 = shalt.err (!%p477_p3)
}
 0x21f   : > { %s481_s10 = scalar_lea.hbm %s635_s5, 256  ;;  %s485_s19 = scalar_lea.hbm %s683_s3, 512 }
 0x220   : > { %p482_p4 = scmp.ne.s32.totalorder %s635_s5, %s481_s10  ;;  %p486_p9 = scmp.lt.s32.totalorder %s635_s5, %s683_s3 }
 0x221   : > { %p487_p10 = scmp.lt.s32.totalorder %s485_s19, %s481_s10 }
 0x222   : > { %p483_p7 = pnand %p482_p4, %p590_p5 }
 0x223   : > { %p488_p11 = por %p487_p10, %p486_p9 }
 0x224   : > { %p484_p8 = pneg %p483_p7 }
 0x226   : > { %p489_p12 = pnand %p488_p11, %p484_p8 }
 0x228   : > { %492 = shalt.err (!%p489_p12)
}
 0x229   : > { %s530_s25 = smov 128   ;;  %s531_s26 = smov 8  }
 0x22a   : > { %422 = dma.vmem_to_hbm [thread:$0]  (%p590_p5), %s637_s29, 256, %s635_s5, %s640_s6, %s530_s25, %s530_s25, %s531_s26  }
 0x22b PF: > { %p428_p13 = scmp.ge.s32.totalorder %s527_s15, 2  ;;  %s337_s27 = sand.u32 1, %s515_s12  }
 0x22c   : > { %s338_s28 = scalar_lea.sflag [#allocation3], %s337_s27 }
 0x22d   : > { %p425_p0 = pnand %p428_p13, %p594_p6 }
 0x22f   : > { %p426_p1 = pneg %p425_p0 }
 0x231   : > { %510 = dma.done.wait (%p426_p1), %s338_s28, 256  }
 0x232   : > { %512 = vsyncadd (%p426_p1), %s338_s28, 4294967040  ;;  %p13_p2 = scmp.ge.s32.totalorder %s577_s18, 4   ;;  %s686_s12 = smov %s519_s13 }
 0x233   : > { %s687_s13 = smov %s523_s14  ;;  %s688_s14 = smov %s588_s21 }
 0x234   : > { %s689_s15 = smov %s577_s18  ;;  %15 = sbr.rel (!%p13_p2) target bundleno = 3 (0x3), region = 67 }
 0x239   :  { %343 = vsyncpa [#allocation3], 1 }
 0x23a   :  { %345 = vsyncpa [#allocation3 + $0x1], 1 }

</bundles_post_ra>
